<compile_context>
chip_gen: v5e
topology: v5e:2x2
jax: 0.10.0
libtpu: 0.0.40
codegen_flags: <defaults>
</compile_context>

<pallas_src>
import functools

import jax
import jax.numpy as jnp
from jax import lax
from jax.experimental import pallas as pl
from jax.experimental.pallas import tpu as pltpu

ALPHA = 1.0
GAMMA = 2.0


def _focal_loss_kernel(x_ref, t_ref, out_ref, *, alpha, gamma, num_classes):
    """Per-tile focal-loss partial sum, written as one lane-dense (1,128) row.

    x_ref: (nb, C, bs, 128) logits (any float dtype); t_ref: (nb, bs, 128) ints.
    """
    t = t_ref[...].astype(jnp.int32)                  # widen on the VPU (cheap)
    valid = (t >= 0) & (t < num_classes)              # ignore_index / pad pixels

    if num_classes <= 16:
        # Small C: static unroll; fused max / exp-sum / label-gather pass.
        x = x_ref[...].astype(jnp.float32)            # (nb, C, bs, 128)
        m = jnp.max(x, axis=1)                        # (nb, bs, 128)
        s = jnp.zeros_like(m)
        xm_t = jnp.zeros_like(m)
        for ci in range(num_classes):
            xc = x[:, ci] - m
            s = s + jnp.exp(xc)
            xm_t = xm_t + jnp.where(t == ci, xc, 0.0)
    else:
        # Large C: fori_loop over class slices read straight from VMEM
        # (bounded live ranges, no giant unroll / vreg spill).
        def _cls(ci):
            return x_ref[:, pl.ds(ci, 1)][:, 0].astype(jnp.float32)

        m = lax.fori_loop(1, num_classes,
                          lambda ci, acc: jnp.maximum(acc, _cls(ci)),
                          _cls(0))

        def _body(ci, carry):
            s, xm_t = carry
            xc = _cls(ci) - m
            return s + jnp.exp(xc), xm_t + jnp.where(t == ci, xc, 0.0)

        s, xm_t = lax.fori_loop(0, num_classes, _body,
                                (jnp.zeros_like(m), jnp.zeros_like(m)))

    # log p_t for the labelled class; pixels matching no class are masked to 0.
    logp_t = xm_t - jnp.log(s)
    p_t = jnp.exp(logp_t)
    q = 1.0 - p_t
    if float(gamma) == 2.0:
        w = q * q                   # avoid pow -> exp(gamma*log(.)) on the EUP
    else:
        w = q ** gamma
    loss_px = jnp.where(valid, (-alpha) * w * logp_t, 0.0)   # (nb, bs, 128)

    # One lane-dense partial row per grid step (no resident accumulator).
    out_ref[...] = jnp.sum(loss_px, axis=(0, 1)).reshape(out_ref.shape)


def _round_up(x, m):
    return ((x + m - 1) // m) * m


def _sublane_align(dtype):
    return {4: 8, 2: 16, 1: 32}.get(jnp.dtype(dtype).itemsize, 8)


def focal_loss(inputs, targets, alpha=ALPHA, gamma=GAMMA):
    """inputs: (N, C, H, W) float logits; targets: (N, H, W) integer labels."""
    n, c, h, w = inputs.shape
    hw = h * w
    lane = 128

    # Keep logits in their input dtype (bf16 stays bf16 -> half the HBM bytes);
    # keep targets narrow, only fold unsupported 64-bit ints down to int32.
    t = targets
    if jnp.dtype(t.dtype).itemsize == 8:
        t = t.astype(jnp.int32)

    row_align = max(_sublane_align(inputs.dtype), _sublane_align(t.dtype))

    # ----- tile sizing -------------------------------------------------------
    logit_bytes_per_row = c * lane * jnp.dtype(inputs.dtype).itemsize
    budget = 2 << 20        # ~2 MiB of logits per step: safe on v7x (64 MiB VMEM)
    vmem_limit = None
    try:                    # bigger tiles + raised scoped-VMEM on v5e/v6e
        if pltpu.get_tpu_info().vmem_capacity_bytes >= (100 << 20):
            budget = 6 << 20
            vmem_limit = 64 << 20
    except Exception:
        pass

    rows = -(-hw // lane)                                    # ceil(hw / 128)
    max_rows = max(row_align, budget // max(logit_bytes_per_row, 1))
    max_rows = max(row_align, (max_rows // row_align) * row_align)
    bs = min(max_rows, _round_up(rows, row_align))
    rows_pad = _round_up(rows, bs)
    n_row_blocks = rows_pad // bs

    # Small-image regime: block over the batch axis too so each grid step
    # still moves a sizable chunk of HBM.
    nb = 1
    if n_row_blocks == 1 and n > 1:
        cap = max(1, budget // max(bs * logit_bytes_per_row, 1))
        for d in range(min(n, cap), 0, -1):
            if n % d == 0:
                nb = d
                break
    n_batch_blocks = n // nb

    # ----- layout: contiguous reshape + spatial pad (no HBM transpose) -------
    pad_px = rows_pad * lane - hw
    x = inputs.reshape(n, c, hw)
    tt = t.reshape(n, hw)
    if pad_px:
        pad_label = min(c, jnp.iinfo(tt.dtype).max)   # matches no class -> 0 loss
        x = jnp.pad(x, ((0, 0), (0, 0), (0, pad_px)))
        tt = jnp.pad(tt, ((0, 0), (0, pad_px)), constant_values=pad_label)
    x = x.reshape(n, c, rows_pad, lane)
    tt = tt.reshape(n, rows_pad, lane)

    kernel = functools.partial(
        _focal_loss_kernel,
        alpha=float(alpha), gamma=float(gamma), num_classes=c)

    compiler_kwargs = dict(dimension_semantics=("parallel", "parallel"))
    if vmem_limit is not None:
        compiler_kwargs["vmem_limit_bytes"] = vmem_limit

    partials = pl.pallas_call(
        kernel,
        out_shape=jax.ShapeDtypeStruct((n_batch_blocks, n_row_blocks, 1, lane),
                                       jnp.float32),
        grid_spec=pltpu.PrefetchScalarGridSpec(
            num_scalar_prefetch=0,
            grid=(n_batch_blocks, n_row_blocks),
            in_specs=[
                pl.BlockSpec((nb, c, bs, lane), lambda i, j: (i, 0, j, 0)),  # logits
                pl.BlockSpec((nb, bs, lane), lambda i, j: (i, j, 0)),        # targets
            ],
            out_specs=pl.BlockSpec((1, 1, 1, lane), lambda i, j: (i, j, 0, 0)),
        ),
        compiler_params=pltpu.CompilerParams(**compiler_kwargs),
    )(x, tt)

    # Tiny final reduction; mean over the UNPADDED pixel count.
    return jnp.sum(partials) / (n * hw)


def _reference_focal_loss(inputs, targets, alpha=ALPHA, gamma=GAMMA):
    """Plain-JAX transcription of the PyTorch forward (for verification)."""
    p = jax.nn.softmax(inputs.astype(jnp.float32), axis=1)
    loss = jnp.zeros(targets.shape, jnp.float32)
    for ci in range(inputs.shape[1]):
        mask = (targets == ci).astype(jnp.float32)
        p_t = p[:, ci, :, :]
        loss = loss - alpha * mask * (1.0 - p_t) ** gamma * jnp.log(p_t)
    return loss.mean()


if __name__ == "__main__":
    key = jax.random.PRNGKey(0)
    k1, k2, k3, k4 = jax.random.split(key, 4)

    # Case 1: the module's canonical small shape.
    N, C, H, W = 2, 4, 16, 16
    inputs = jax.random.normal(k1, (N, C, H, W), dtype=jnp.float32)
    targets = jax.random.randint(k2, (N, H, W), 0, C, dtype=jnp.int32)
    targets = targets.at[:, :2, :2].set(255)         # ignore_index pixels
    out = jax.block_until_ready(focal_loss(inputs, targets))
    ref = _reference_focal_loss(inputs, targets)
    assert jnp.allclose(out, ref, rtol=5e-5, atol=1e-6), (out, ref)

    # Case 2: H*W not a multiple of 128 + narrow (uint8) labels — exercises the
    # padding path and the narrow-target path.
    N2, C2, H2, W2 = 2, 3, 13, 19
    inputs2 = jax.random.normal(k3, (N2, C2, H2, W2), dtype=jnp.float32)
    targets2 = jax.random.randint(k4, (N2, H2, W2), 0, C2,
                                  dtype=jnp.int32).astype(jnp.uint8)
    targets2 = targets2.at[:, 0, :3].set(255)         # ignore_index pixels
    out2 = jax.block_until_ready(focal_loss(inputs2, targets2))
    ref2 = _reference_focal_loss(inputs2, targets2)
    assert jnp.allclose(out2, ref2, rtol=5e-5, atol=1e-6), (out2, ref2)

    print("KERNEL_OK")
</pallas_src>

<mosaic_0001>
module attributes {stable_mosaic.version = 11 : i64} {
  func.func @_focal_loss_kernel(%arg0: i32, %arg1: i32, %arg2: memref<2x4x8x128xf32, #tpu.memory_space<vmem>>, %arg3: memref<2x8x128xi32, #tpu.memory_space<vmem>>, %arg4: memref<1x1x1x128xf32, #tpu.memory_space<vmem>>) attributes {dimension_semantics = [#tpu.dimension_semantics<parallel>, #tpu.dimension_semantics<parallel>], iteration_bounds = array<i64: 1, 1>, scalar_prefetch = 0 : i64, scratch_operands = 0 : i64, tpu.core_type = #tpu.core_type<tc>, window_params = [{transform_indices = @transform_0, window_bounds = array<i64: 2, 4, 8, 128>}, {transform_indices = @transform_1, window_bounds = array<i64: 2, 8, 128>}, {transform_indices = @transform_2, window_bounds = array<i64: 1, 1, 1, 128>}]} {
    %c0 = arith.constant 0 : index
    %c0_0 = arith.constant 0 : index
    %c0_1 = arith.constant 0 : index
    %0 = vector.load %arg3[%c0, %c0_0, %c0_1] : memref<2x8x128xi32, #tpu.memory_space<vmem>>, vector<2x8x128xi32>
    %c0_i32 = arith.constant 0 : i32
    %1 = vector.broadcast %c0_i32 : i32 to vector<2x8x128xi32>
    %2 = arith.cmpi sge, %0, %1 : vector<2x8x128xi32>
    %c4_i32 = arith.constant 4 : i32
    %3 = vector.broadcast %c4_i32 : i32 to vector<2x8x128xi32>
    %4 = arith.cmpi slt, %0, %3 : vector<2x8x128xi32>
    %5 = arith.andi %2, %4 : vector<2x8x128xi1>
    %c0_2 = arith.constant 0 : index
    %c0_3 = arith.constant 0 : index
    %c0_4 = arith.constant 0 : index
    %c0_5 = arith.constant 0 : index
    %6 = vector.load %arg2[%c0_2, %c0_3, %c0_4, %c0_5] : memref<2x4x8x128xf32, #tpu.memory_space<vmem>>, vector<2x4x8x128xf32>
    %cst = arith.constant dense<0xFF800000> : vector<2x8x128xf32>
    %7 = vector.multi_reduction <maximumf>, %6, %cst [1] : vector<2x4x8x128xf32> to vector<2x8x128xf32>
    %cst_6 = arith.constant 0.000000e+00 : f32
    %8 = vector.broadcast %cst_6 : f32 to vector<2x8x128xf32>
    %cst_7 = arith.constant 0.000000e+00 : f32
    %9 = vector.broadcast %cst_7 : f32 to vector<2x8x128xf32>
    %10 = vector.extract_strided_slice %6 {offsets = [0, 0, 0, 0], sizes = [2, 1, 8, 128], strides = [1, 1, 1, 1]} : vector<2x4x8x128xf32> to vector<2x1x8x128xf32>
    %11 = vector.shape_cast %10 : vector<2x1x8x128xf32> to vector<2x8x128xf32>
    %12 = arith.subf %11, %7 : vector<2x8x128xf32>
    %13 = math.exp %12 : vector<2x8x128xf32>
    %14 = arith.addf %8, %13 : vector<2x8x128xf32>
    %c0_i32_8 = arith.constant 0 : i32
    %15 = vector.broadcast %c0_i32_8 : i32 to vector<2x8x128xi32>
    %16 = arith.cmpi eq, %0, %15 : vector<2x8x128xi32>
    %cst_9 = arith.constant 0.000000e+00 : f32
    %17 = vector.broadcast %cst_9 : f32 to vector<2x8x128xf32>
    %18 = arith.select %16, %12, %17 : vector<2x8x128xi1>, vector<2x8x128xf32>
    %19 = arith.addf %9, %18 : vector<2x8x128xf32>
    %20 = vector.extract_strided_slice %6 {offsets = [0, 1, 0, 0], sizes = [2, 1, 8, 128], strides = [1, 1, 1, 1]} : vector<2x4x8x128xf32> to vector<2x1x8x128xf32>
    %21 = vector.shape_cast %20 : vector<2x1x8x128xf32> to vector<2x8x128xf32>
    %22 = arith.subf %21, %7 : vector<2x8x128xf32>
    %23 = math.exp %22 : vector<2x8x128xf32>
    %24 = arith.addf %14, %23 : vector<2x8x128xf32>
    %c1_i32 = arith.constant 1 : i32
    %25 = vector.broadcast %c1_i32 : i32 to vector<2x8x128xi32>
    %26 = arith.cmpi eq, %0, %25 : vector<2x8x128xi32>
    %cst_10 = arith.constant 0.000000e+00 : f32
    %27 = vector.broadcast %cst_10 : f32 to vector<2x8x128xf32>
    %28 = arith.select %26, %22, %27 : vector<2x8x128xi1>, vector<2x8x128xf32>
    %29 = arith.addf %19, %28 : vector<2x8x128xf32>
    %30 = vector.extract_strided_slice %6 {offsets = [0, 2, 0, 0], sizes = [2, 1, 8, 128], strides = [1, 1, 1, 1]} : vector<2x4x8x128xf32> to vector<2x1x8x128xf32>
    %31 = vector.shape_cast %30 : vector<2x1x8x128xf32> to vector<2x8x128xf32>
    %32 = arith.subf %31, %7 : vector<2x8x128xf32>
    %33 = math.exp %32 : vector<2x8x128xf32>
    %34 = arith.addf %24, %33 : vector<2x8x128xf32>
    %c2_i32 = arith.constant 2 : i32
    %35 = vector.broadcast %c2_i32 : i32 to vector<2x8x128xi32>
    %36 = arith.cmpi eq, %0, %35 : vector<2x8x128xi32>
    %cst_11 = arith.constant 0.000000e+00 : f32
    %37 = vector.broadcast %cst_11 : f32 to vector<2x8x128xf32>
    %38 = arith.select %36, %32, %37 : vector<2x8x128xi1>, vector<2x8x128xf32>
    %39 = arith.addf %29, %38 : vector<2x8x128xf32>
    %40 = vector.extract_strided_slice %6 {offsets = [0, 3, 0, 0], sizes = [2, 1, 8, 128], strides = [1, 1, 1, 1]} : vector<2x4x8x128xf32> to vector<2x1x8x128xf32>
    %41 = vector.shape_cast %40 : vector<2x1x8x128xf32> to vector<2x8x128xf32>
    %42 = arith.subf %41, %7 : vector<2x8x128xf32>
    %43 = math.exp %42 : vector<2x8x128xf32>
    %44 = arith.addf %34, %43 : vector<2x8x128xf32>
    %c3_i32 = arith.constant 3 : i32
    %45 = vector.broadcast %c3_i32 : i32 to vector<2x8x128xi32>
    %46 = arith.cmpi eq, %0, %45 : vector<2x8x128xi32>
    %cst_12 = arith.constant 0.000000e+00 : f32
    %47 = vector.broadcast %cst_12 : f32 to vector<2x8x128xf32>
    %48 = arith.select %46, %42, %47 : vector<2x8x128xi1>, vector<2x8x128xf32>
    %49 = arith.addf %39, %48 : vector<2x8x128xf32>
    %50 = math.log %44 : vector<2x8x128xf32>
    %51 = arith.subf %49, %50 : vector<2x8x128xf32>
    %52 = math.exp %51 : vector<2x8x128xf32>
    %cst_13 = arith.constant 1.000000e+00 : f32
    %53 = vector.broadcast %cst_13 : f32 to vector<2x8x128xf32>
    %54 = arith.subf %53, %52 : vector<2x8x128xf32>
    %55 = arith.mulf %54, %54 : vector<2x8x128xf32>
    %cst_14 = arith.constant -1.000000e+00 : f32
    %56 = vector.broadcast %cst_14 : f32 to vector<2x8x128xf32>
    %57 = arith.mulf %56, %55 : vector<2x8x128xf32>
    %58 = arith.mulf %57, %51 : vector<2x8x128xf32>
    %cst_15 = arith.constant 0.000000e+00 : f32
    %59 = vector.broadcast %cst_15 : f32 to vector<2x8x128xf32>
    %60 = arith.select %5, %58, %59 : vector<2x8x128xi1>, vector<2x8x128xf32>
    %cst_16 = arith.constant dense<0.000000e+00> : vector<128xf32>
    %61 = vector.multi_reduction <add>, %60, %cst_16 [0, 1] : vector<2x8x128xf32> to vector<128xf32>
    %62 = vector.shape_cast %61 : vector<128xf32> to vector<1x1x1x128xf32>
    %c0_17 = arith.constant 0 : index
    %c0_18 = arith.constant 0 : index
    %c0_19 = arith.constant 0 : index
    %c0_20 = arith.constant 0 : index
    %63 = vector.load %arg4[%c0_17, %c0_18, %c0_19, %c0_20] : memref<1x1x1x128xf32, #tpu.memory_space<vmem>>, vector<1x1x1x128xf32>
    tpu.vector_store %arg4[%c0_17, %c0_18, %c0_19, %c0_20], %62 {strides = array<i32>} : memref<1x1x1x128xf32, #tpu.memory_space<vmem>>, vector<1x1x1x128xf32>,
    return
  }
  func.func @transform_0(%arg0: i32, %arg1: i32) -> (i32, i32, i32, i32) {
    %c0_i32 = arith.constant 0 : i32
    %c0_i32_0 = arith.constant 0 : i32
    %c0_i32_1 = arith.constant 0 : i32
    return %arg0, %c0_i32, %arg1, %c0_i32_0 : i32, i32, i32, i32
  }
  func.func @transform_1(%arg0: i32, %arg1: i32) -> (i32, i32, i32) {
    %c0_i32 = arith.constant 0 : i32
    %c0_i32_0 = arith.constant 0 : i32
    return %arg0, %arg1, %c0_i32 : i32, i32, i32
  }
  func.func @transform_2(%arg0: i32, %arg1: i32) -> (i32, i32, i32, i32) {
    %c0_i32 = arith.constant 0 : i32
    %c0_i32_0 = arith.constant 0 : i32
    %c0_i32_1 = arith.constant 0 : i32
    return %arg0, %arg1, %c0_i32, %c0_i32_0 : i32, i32, i32, i32
  }
}

</mosaic_0001>

<bundles_post_ra>
// kernel: tpu_custom_call.1
= control target key start
LH: loop header
LB: loop body
LE: loop exit
PB: predicated region body
PF: predicated region fallthrough
CT: control target
= control target key end

     0   :  { %7 = vsyncpa [#allocation3], 0  ;;  %s320_s0 = inlined_call_operand.hbm [shape: f32[2,4,8,128], index: 0, kind: input, shape index: {}]   ;;  %s321_s1 = inlined_call_operand.hbm [shape: s32[2,8,128], index: 1, kind: input, shape index: {}]   ;;  %s322_s2 = inlined_call_operand.hbm [shape: f32[1,1,1,128], index: 2, kind: output, shape index: {}]  }
   0x1   :  { %8 = vsyncpa [#allocation6], 0 }
   0x2   :  { %9 = vsyncpa [#allocation4], 0  ;;  %s14_s11 = sshll.u32 %s320_s0, 4  ;;  %s275_s12 = smov [#allocation2]   ;;  %s15_s11 = int_to_ptr.hbm [resolvable:$true] %s14_s11 }
   0x3   :  { %s16_s13 = sshll.u32 %s275_s12, 4  ;;  %s27_s16 = sshll.u32 %s321_s1, 4  ;;  %s17_s13 = int_to_ptr.vmem [resolvable:$true] %s16_s13  ;;  %s28_s16 = int_to_ptr.hbm [resolvable:$true] %s27_s16 }
   0x4   :  { %s276_s17 = smov 128   ;;  %s277_s18 = smov 8  }
   0x5   :  { %22 = dma.hbm_to_vmem [thread:$0]  %s15_s11, 1024, %s17_s13, [#allocation3], %s276_s17, %s276_s17, %s277_s18  }
   0x6   :  { %s278_s19 = smov [#allocation5]  }
   0x7   :  { %s29_s20 = sshll.u32 %s278_s19, 4  ;;  %s30_s20 = int_to_ptr.vmem [resolvable:$true] %s29_s20 }
   0x8   :  { %35 = dma.hbm_to_vmem [thread:$0]  %s28_s16, 256, %s30_s20, [#allocation6], %s276_s17, %s276_s17, %s277_s18  }
   0x9   :  { %269 = dma.done.wait [#allocation3], 1024  }
   0xa   :  { %270 = vsyncadd [#allocation3], 4294966272 }
   0xb   :  { %271 = dma.done.wait [#allocation6], 256  }
   0xc   :  { %272 = vsyncadd [#allocation6], 4294967040  ;;  %v52_v0 = vld [vmem:[#allocation2] sm:$0xff]  ;;  %v53_v1 = vld [vmem:[#allocation2 + $0x8] sm:$0xff]  ;;  %s279_s0 = smov [#allocation7]   ;;  %s157_s23 = sshll.u32 %s322_s2, 4  ;;  %s158_s23 = int_to_ptr.hbm [resolvable:$true] %s157_s23 }
   0xd   :  { %v54_v2 = vld [vmem:[#allocation2 + $0x10] sm:$0xff]  ;;  %v55_v3 = vld [vmem:[#allocation2 + $0x18] sm:$0xff]  ;;  %v56_v4 = vld [vmem:[#allocation2 + $0x20] sm:$0xff]  ;;  %s155_s1 = sshll.u32 %s279_s0, 4  ;;  %s156_s1 = int_to_ptr.vmem [resolvable:$true] %s155_s1 }
   0xe   :  { %v60_v5 = vmax.f32 %v52_v0, %v54_v2  ;;  %v57_v6 = vld [vmem:[#allocation2 + $0x28] sm:$0xff]  ;;  %v58_v7 = vld [vmem:[#allocation2 + $0x30] sm:$0xff]  ;;  %v61_v8 = vmax.f32 %v53_v1, %v55_v3  ;;  %v59_v9 = vld [vmem:[#allocation2 + $0x38] sm:$0xff] }
   0xf   :  { %v63_v10 = vmax.f32 %v56_v4, %v58_v7  ;;  %v64_v12 = vmax.f32 %v57_v6, %v59_v9  ;;  %v301_v27 = vld [vmem:[#allocation5] sm:$0xff]  ;;  %v303_v30 = vld [vmem:[#allocation5 + $0x8] sm:$0xff] }
  0x10   :  { %v62_v11 = vmax.f32 %v60_v5, %v61_v8  ;;  %vm74_vm0 = vcmp.eq.s32.totalorder %v301_v27, 0  ;;  %vm88_vm1 = vcmp.eq.s32.totalorder %v301_v27, 1  ;;  %vm75_vm2 = vcmp.eq.s32.totalorder %v303_v30, 0 }
  0x11   :  { %v65_v13 = vmax.f32 %v63_v10, %v64_v12  ;;  %vm89_vm3 = vcmp.eq.s32.totalorder %v303_v30, 1  ;;  %vm102_vm4 = vcmp.eq.s32.totalorder %v301_v27, 2  ;;  %vm103_vm5 = vcmp.eq.s32.totalorder %v303_v30, 2 }
  0x12   :  { %v66_v14 = vsub.f32 %v52_v0, %v62_v11  ;;  %v80_v15 = vsub.f32 %v53_v1, %v62_v11  ;;  %v94_v16 = vsub.f32 %v54_v2, %v62_v11  ;;  %v108_v22 = vsub.f32 %v55_v3, %v62_v11 }
  0x13   :  { %v67_v17 = vsub.f32 %v56_v4, %v65_v13  ;;  %v81_v19 = vsub.f32 %v57_v6, %v65_v13  ;;  %v95_v21 = vsub.f32 %v58_v7, %v65_v13  ;;  %v109_v28 = vsub.f32 %v59_v9, %v65_v13 }
  0x14   :  { %v68_v18 = vmul.f32 1.442695, %v66_v14  ;;  %v82_v20 = vmul.f32 1.442695, %v80_v15  ;;  %v96_v25 = vmul.f32 1.442695, %v94_v16 }
  0x15   :  { %v70_v23 = vmul.f32 1.442695, %v67_v17  ;;  %v84_v24 = vmul.f32 1.442695, %v81_v19  ;;  %v98_v26 = vmul.f32 1.442695, %v95_v21 }
  0x16   :  { %173 = vpow2.f32 %v68_v18  ;;  %v110_v29 = vmul.f32 1.442695, %v108_v22  ;;  %v112_v31 = vmul.f32 1.442695, %v109_v28  ;;  %v76_v37 = vsel %vm74_vm0, %v66_v14, 0.0 }
  0x17   :  { %175 = vpow2.f32 %v82_v20  ;;  %v90_v38 = vsel %vm88_vm1, %v80_v15, 0.0  ;;  %v77_v40 = vsel %vm75_vm2, %v67_v17, 0.0  ;;  %v91_v42 = vsel %vm89_vm3, %v81_v19, 0.0 }
  0x18   :  { %177 = vpow2.f32 %v70_v23  ;;  %v92_v46 = vadd.f32 %v90_v38, %v76_v37  ;;  %v93_v49 = vadd.f32 %v91_v42, %v77_v40  ;;  %v104_v50 = vsel %vm102_vm4, %v94_v16, 0.0 }
  0x19   :  { %179 = vpow2.f32 %v84_v24  ;;  %v105_v52 = vsel %vm103_vm5, %v95_v21, 0.0  ;;  %vm116_vm6 = vcmp.eq.s32.totalorder %v301_v27, 3  ;;  %vm117_vm7 = vcmp.eq.s32.totalorder %v303_v30, 3 }
  0x1a   :  { %181 = vpow2.f32 %v96_v25  ;;  %v106_v54 = vadd.f32 %v104_v50, %v92_v46  ;;  %v107_v55 = vadd.f32 %v105_v52, %v93_v49  ;;  %v118_v56 = vsel %vm116_vm6, %v108_v22, 0.0 }
  0x1b   :  { %183 = vpow2.f32 %v98_v26  ;;  %v119_v57 = vsel %vm117_vm7, %v109_v28, 0.0  ;;  %vm46_vm8 = vcmp.ge.s32.totalorder %v301_v27, 0  ;;  %vm48_vm9 = vcmp.lt.s32.totalorder %v301_v27, 4 }
  0x1c   :  { %v174_v32 = vpop.eup %173  ;;  %185 = vpow2.f32 %v110_v29  ;;  %v120_v58 = vadd.f32 %v118_v56, %v106_v54  ;;  %v121_v60 = vadd.f32 %v119_v57, %v107_v55  ;;  %vm47_vm10 = vcmp.ge.s32.totalorder %v303_v30, 0  ;;  %vm50_vm12 = vmand %vm46_vm8, %vm48_vm9 }
  0x1d   :  { %v176_v33 = vpop.eup %175  ;;  %187 = vpow2.f32 %v112_v31  ;;  %vm49_vm11 = vcmp.lt.s32.totalorder %v303_v30, 4 }
  0x1e   :  { %v178_v34 = vpop.eup %177  ;;  %v86_v35 = vadd.f32 %v176_v33, %v174_v32  ;;  %vm51_vm13 = vmand %vm47_vm10, %vm49_vm11 }
  0x1f   :  { %v180_v36 = vpop.eup %179 }
  0x20   :  { %v182_v39 = vpop.eup %181  ;;  %v87_v41 = vadd.f32 %v180_v36, %v178_v34 }
  0x21   :  { %v184_v43 = vpop.eup %183  ;;  %v100_v44 = vadd.f32 %v182_v39, %v86_v35 }
  0x22   :  { %v186_v45 = vpop.eup %185  ;;  %v101_v47 = vadd.f32 %v184_v43, %v87_v41 }
  0x23   :  { %v188_v48 = vpop.eup %187  ;;  %v114_v51 = vadd.f32 %v186_v45, %v100_v44 }
  0x24   :  { %v115_v53 = vadd.f32 %v188_v48, %v101_v47 }
  0x25   :  { %189 = vlog2.f32 %v114_v51 }
  0x26   :  { %191 = vlog2.f32 %v115_v53 }
  0x2b   :  { %v190_v59 = vpop.eup %189 }
  0x2c   :  { %v192_v61 = vpop.eup %191  ;;  %v123_v62 = vmul.f32 0.6931472, %v190_v59 }
  0x2d   :  { %v125_v63 = vmul.f32 0.6931472, %v192_v61 }
  0x2e   :  { %v126_v0 = vsub.f32 %v120_v58, %v123_v62 }
  0x2f   :  { %v127_v1 = vsub.f32 %v121_v60, %v125_v63 }
  0x30   :  { %v128_v2 = vmul.f32 1.442695, %v126_v0 }
  0x31   :  { %v130_v3 = vmul.f32 1.442695, %v127_v1 }
  0x32   :  { %193 = vpow2.f32 %v128_v2 }
  0x33   :  { %195 = vpow2.f32 %v130_v3 }
  0x38   :  { %v194_v4 = vpop.eup %193 }
  0x39   :  { %v196_v5 = vpop.eup %195  ;;  %v132_v6 = vsub.f32 1.0, %v194_v4 }
  0x3a   :  { %v133_v7 = vsub.f32 1.0, %v196_v5 }
  0x3b   :  { %v134_v8 = vmul.f32 %v132_v6, %v132_v6 }
  0x3c   :  { %v135_v9 = vmul.f32 %v133_v7, %v133_v7 }
  0x3d   :  { %v136_v10 = vmul.f32 -1.0, %v134_v8 }
  0x3e   :  { %v137_v11 = vmul.f32 -1.0, %v135_v9 }
  0x3f   :  { %v138_v12 = vmul.f32 %v136_v10, %v126_v0 }
  0x40   :  { %v139_v13 = vmul.f32 %v137_v11, %v127_v1 }
  0x41   :  { %v140_v14 = vsel %vm50_vm12, %v138_v12, 0.0 }
  0x42   :  { %v141_v15 = vsel %vm51_vm13, %v139_v13, 0.0 }
  0x43   :  { %v142_v16 = vadd.f32 %v141_v15, %v140_v14 }
  0x45   :  { %v143_v17 = vrot.slane %v142_v16, 4 }
  0x47   :  { %v144_v18 = vadd.f32 %v143_v17, %v142_v16 }
  0x49   :  { %v145_v19 = vrot.slane %v144_v18, 2 }
  0x4b   :  { %v146_v20 = vadd.f32 %v145_v19, %v144_v18 }
  0x4d   :  { %v147_v21 = vrot.slane %v146_v20, 1 }
  0x4f   :  { %v148_v22 = vadd.f32 %v147_v21, %v146_v20 }
  0x51   :  { %149 = vst [vmem:[#allocation7] sm:$0x1] %v148_v22 }
  0x52   :  { %160 = dma.vmem_to_hbm [thread:$0]  %s156_s1, 16, %s158_s23, [#allocation4]  }
  0x53   :  { %273 = dma.done.wait [#allocation4], 16  }
  0x54   :  { %274 = vsyncadd [#allocation4], 4294967280 }
  0x55   :  { %165 = vsyncpa [#allocation3], 1 }
  0x56   :  { %166 = vsyncpa [#allocation6], 1 }
  0x57   :  { %167 = vsyncpa [#allocation4], 1 }

</bundles_post_ra>
